<compile_context>
chip_gen: v7x
topology: tpu7x:2x2x1
jax: 0.10.0
libtpu: 0.0.40
codegen_flags: <defaults>
</compile_context>

<pallas_src>
import functools

import jax
import jax.numpy as jnp
from jax.experimental import pallas as pl
from jax.experimental.pallas import tpu as pltpu

# ---------------------------------------------------------------------------
# sizes
# ---------------------------------------------------------------------------
COND_DIM = 13            # per-frame pose condition vector
HIDDEN = 32              # MLP hidden width
D_OUT = 3 + 4 + 3        # delta_xyz, delta_rot, delta_scale
_MAX_TILE_N = 32768      # gaussians per grid step (VMEM-budgeted, see header)


def _round_up(x, m):
    return ((x + m - 1) // m) * m


def _choose_tile(n):
    """Lane-dense tile along N: multiple of 128, >=2 grid steps for large N."""
    if n <= 1024:
        return _round_up(max(n, 1), 128)
    half = _round_up((n + 1) // 2, 128)   # keep both v7x TensorCores busy
    return min(_MAX_TILE_N, half)


# ---------------------------------------------------------------------------
# Pallas kernel (channels-first / SoA):
#   h       = relu(W1x^T @ xyz + b1_eff)          (pose folded into b1_eff)
#   d_xyz   = W2x^T @ h + b2x     -> xyz_out = xyz + d_xyz
#   d_rot   = W2r^T @ h + b2r     -> rot_out = rot + d_rot
#   d_scale = W2s^T @ h + b2s     -> scl_out = scale + d_scale
#   loss partial = sum_valid_cols(d_xyz^2)   (lane 0 of the (1,128) block)
# ---------------------------------------------------------------------------
def _deform_kernel(xyz_ref, rot_ref, scl_ref,
                   w1t_ref, b1_ref,
                   w2x_ref, b2x_ref, w2r_ref, b2r_ref, w2s_ref, b2s_ref,
                   xyz_out_ref, rot_out_ref, scl_out_ref, loss_ref,
                   *, n_cols):
    tile_n = xyz_ref.shape[1]

    xyz = xyz_ref[...]                                             # (3, tn)
    h = jnp.dot(w1t_ref[...], xyz, preferred_element_type=jnp.float32)
    h = jnp.maximum(h + b1_ref[...], 0.0)                          # (H, tn)

    d_xyz = (jnp.dot(w2x_ref[...], h, preferred_element_type=jnp.float32)
             + b2x_ref[...])                                       # (3, tn)
    xyz_out_ref[...] = xyz + d_xyz
    rot_out_ref[...] = rot_ref[...] + (
        jnp.dot(w2r_ref[...], h, preferred_element_type=jnp.float32)
        + b2r_ref[...])
    scl_out_ref[...] = scl_ref[...] + (
        jnp.dot(w2s_ref[...], h, preferred_element_type=jnp.float32)
        + b2s_ref[...])

    # masked partial sum of d_xyz^2 (mask only matters on the ragged last tile)
    col = (pl.program_id(0) * tile_n
           + jax.lax.broadcasted_iota(jnp.int32, (1, tile_n), 1))
    valid = col < n_cols
    partial = jnp.sum(jnp.where(valid, d_xyz * d_xyz, 0.0))

    lane = jax.lax.broadcasted_iota(jnp.int32, (1, 128), 1)
    loss_ref[...] = jnp.where(lane == 0, partial, 0.0)


def _run_deform(xyz_t, rot_t, scl_t, w1t, b1c,
                w2x, b2x, w2r, b2r, w2s, b2s):
    n = xyz_t.shape[1]
    tile_n = _choose_tile(n)
    grid_n = pl.cdiv(n, tile_n)
    hidden = w1t.shape[0]

    def col_spec(c):
        return pl.BlockSpec((c, tile_n), lambda i: (0, i))

    def full_spec(shape):
        return pl.BlockSpec(shape, lambda i: (0, 0))

    kernel = functools.partial(_deform_kernel, n_cols=n)

    return pl.pallas_call(
        kernel,
        out_shape=(
            jax.ShapeDtypeStruct((3, n), jnp.float32),            # deformed xyz
            jax.ShapeDtypeStruct((4, n), jnp.float32),            # deformed rot
            jax.ShapeDtypeStruct((3, n), jnp.float32),            # deformed scale
            jax.ShapeDtypeStruct((1, grid_n * 128), jnp.float32),  # loss partials
        ),
        grid=(grid_n,),
        in_specs=[
            col_spec(3),                       # xyz      (3, N)
            col_spec(4),                       # rot      (4, N)
            col_spec(3),                       # scale    (3, N)
            full_spec((hidden, 3)),            # W1x^T    (H, 3)
            full_spec((hidden, 1)),            # b1_eff   (H, 1)
            full_spec((3, hidden)),            # W2_xyz^T (3, H)
            full_spec((3, 1)),                 # b2_xyz   (3, 1)
            full_spec((4, hidden)),            # W2_rot^T (4, H)
            full_spec((4, 1)),                 # b2_rot   (4, 1)
            full_spec((3, hidden)),            # W2_scl^T (3, H)
            full_spec((3, 1)),                 # b2_scl   (3, 1)
        ],
        out_specs=(
            col_spec(3),
            col_spec(4),
            col_spec(3),
            pl.BlockSpec((1, 128), lambda i: (0, i)),
        ),
        compiler_params=pltpu.CompilerParams(
            dimension_semantics=("parallel",),
            vmem_limit_bytes=32 * 1024 * 1024),
    )(xyz_t, rot_t, scl_t, w1t, b1c, w2x, b2x, w2r, b2r, w2s, b2s)


# ---------------------------------------------------------------------------
# NonRigidDeform module (concrete instantiation)
# ---------------------------------------------------------------------------
class NonRigidDeform:
    """Non-rigid deformer: pose-conditioned MLP residuals, fused Pallas path."""

    def __init__(self, key):
        k1, k2, k3, k4 = jax.random.split(key, 4)
        d_in = 3 + COND_DIM
        self.w1 = jax.random.normal(k1, (d_in, HIDDEN), jnp.float32) * 0.1
        self.b1 = jax.random.normal(k2, (1, HIDDEN), jnp.float32) * 0.01
        self.w2 = jax.random.normal(k3, (HIDDEN, D_OUT), jnp.float32) * 0.1
        self.b2 = jax.random.normal(k4, (1, D_OUT), jnp.float32) * 0.01

    def __call__(self, gaussians, iteration, camera, compute_loss=True):
        xyz = gaussians["xyz"]           # (N, 3)
        rot = gaussians["rotation"]      # (N, 4)
        scale = gaussians["scaling"]     # (N, 3)
        pose_cond = camera["pose_cond"]  # (COND_DIM,)
        n = xyz.shape[0]

        # Fold the (row-constant) pose conditioning into the first-layer bias:
        #   [xyz | pose] @ W1 + b1 == xyz @ W1[:3] + (pose @ W1[3:] + b1)
        b1_eff = (jnp.dot(pose_cond, self.w1[3:],
                          precision=jax.lax.Precision.HIGHEST)
                  + self.b1[0])                                   # (H,)
        b1_col = b1_eff[:, None]                                  # (H, 1)
        w1t = self.w1[:3].T                                       # (H, 3)

        # Split the second layer per output group (lands directly per-output).
        w2x, b2x = self.w2[:, 0:3].T, self.b2[:, 0:3].T           # (3,H), (3,1)
        w2r, b2r = self.w2[:, 3:7].T, self.b2[:, 3:7].T           # (4,H), (4,1)
        w2s, b2s = self.w2[:, 7:10].T, self.b2[:, 7:10].T         # (3,H), (3,1)

        # Channels-first (SoA) repack for lane-dense kernel I/O.
        xyz_t, rot_t, scl_t = xyz.T, rot.T, scale.T

        xyz_d_t, rot_d_t, scl_d_t, loss_parts = _run_deform(
            xyz_t, rot_t, scl_t, w1t, b1_col, w2x, b2x, w2r, b2r, w2s, b2s)

        deformed = {
            "xyz": xyz_d_t.T,
            "rotation": rot_d_t.T,
            "scaling": scl_d_t.T,
        }
        loss_reg = None
        if compute_loss:
            loss_reg = jnp.sum(loss_parts) / (n * 3)
        return deformed, loss_reg


# ---------------------------------------------------------------------------
# demo / correctness check
# ---------------------------------------------------------------------------
def _reference(feat, w1, b1, w2, b2):
    h = jnp.maximum(feat @ w1 + b1, 0.0)
    return h @ w2 + b2


if __name__ == "__main__":
    key = jax.random.PRNGKey(0)
    k_mod, k_xyz, k_rot, k_scale, k_pose = jax.random.split(key, 5)

    N = 256  # small number of gaussians
    gaussians = {
        "xyz": jax.random.normal(k_xyz, (N, 3), jnp.float32),
        "rotation": jax.random.normal(k_rot, (N, 4), jnp.float32),
        "scaling": jax.random.normal(k_scale, (N, 3), jnp.float32),
    }
    camera = {"pose_cond": jax.random.normal(k_pose, (COND_DIM,), jnp.float32)}

    deformer = NonRigidDeform(k_mod)
    deformed, loss = deformer(gaussians, iteration=0, camera=camera,
                              compute_loss=True)
    jax.block_until_ready(deformed)
    jax.block_until_ready(loss)

    # verify fused Pallas path against the pure-JAX reference MLP
    cond = jnp.broadcast_to(camera["pose_cond"][None, :], (N, COND_DIM))
    feat = jnp.concatenate([gaussians["xyz"], cond], axis=-1)
    ref = _reference(feat, deformer.w1, deformer.b1, deformer.w2, deformer.b2)

    # tolerances cover possible bf16-pass MXU f32 matmuls inside the kernel
    TOL = dict(atol=5e-3, rtol=5e-3)
    got_xyz = deformed["xyz"] - gaussians["xyz"]
    assert jnp.allclose(got_xyz, ref[:, 0:3], **TOL)
    got_rot = deformed["rotation"] - gaussians["rotation"]
    assert jnp.allclose(got_rot, ref[:, 3:7], **TOL)
    got_scale = deformed["scaling"] - gaussians["scaling"]
    assert jnp.allclose(got_scale, ref[:, 7:10], **TOL)

    ref_loss = jnp.mean(jnp.square(ref[:, 0:3]))
    assert jnp.allclose(loss, ref_loss, **TOL)

    print("KERNEL_OK")
</pallas_src>

<mosaic_0001>
module attributes {stable_mosaic.version = 11 : i64} {
  func.func @_deform_kernel(%arg0: i32, %arg1: memref<3x256xf32, #tpu.memory_space<vmem>>, %arg2: memref<4x256xf32, #tpu.memory_space<vmem>>, %arg3: memref<3x256xf32, #tpu.memory_space<vmem>>, %arg4: memref<32x3xf32, #tpu.memory_space<vmem>>, %arg5: memref<32x1xf32, #tpu.memory_space<vmem>>, %arg6: memref<3x32xf32, #tpu.memory_space<vmem>>, %arg7: memref<3x1xf32, #tpu.memory_space<vmem>>, %arg8: memref<4x32xf32, #tpu.memory_space<vmem>>, %arg9: memref<4x1xf32, #tpu.memory_space<vmem>>, %arg10: memref<3x32xf32, #tpu.memory_space<vmem>>, %arg11: memref<3x1xf32, #tpu.memory_space<vmem>>, %arg12: memref<3x256xf32, #tpu.memory_space<vmem>>, %arg13: memref<4x256xf32, #tpu.memory_space<vmem>>, %arg14: memref<3x256xf32, #tpu.memory_space<vmem>>, %arg15: memref<1x128xf32, #tpu.memory_space<vmem>>) attributes {dimension_semantics = [#tpu.dimension_semantics<parallel>], iteration_bounds = array<i64: 1>, scalar_prefetch = 0 : i64, scratch_operands = 0 : i64, tpu.core_type = #tpu.core_type<tc>, window_params = [{transform_indices = @transform_0, window_bounds = array<i64: 3, 256>}, {transform_indices = @transform_1, window_bounds = array<i64: 4, 256>}, {transform_indices = @transform_2, window_bounds = array<i64: 3, 256>}, {pipeline_mode = #tpu.pipeline_mode<synchronous>, transform_indices = @transform_3, window_bounds = array<i64: 32, 3>}, {pipeline_mode = #tpu.pipeline_mode<synchronous>, transform_indices = @transform_4, window_bounds = array<i64: 32, 1>}, {pipeline_mode = #tpu.pipeline_mode<synchronous>, transform_indices = @transform_5, window_bounds = array<i64: 3, 32>}, {pipeline_mode = #tpu.pipeline_mode<synchronous>, transform_indices = @transform_6, window_bounds = array<i64: 3, 1>}, {pipeline_mode = #tpu.pipeline_mode<synchronous>, transform_indices = @transform_7, window_bounds = array<i64: 4, 32>}, {pipeline_mode = #tpu.pipeline_mode<synchronous>, transform_indices = @transform_8, window_bounds = array<i64: 4, 1>}, {pipeline_mode = #tpu.pipeline_mode<synchronous>, transform_indices = @transform_9, window_bounds = array<i64: 3, 32>}, {pipeline_mode = #tpu.pipeline_mode<synchronous>, transform_indices = @transform_10, window_bounds = array<i64: 3, 1>}, {transform_indices = @transform_11, window_bounds = array<i64: 3, 256>}, {transform_indices = @transform_12, window_bounds = array<i64: 4, 256>}, {transform_indices = @transform_13, window_bounds = array<i64: 3, 256>}, {transform_indices = @transform_14, window_bounds = array<i64: 1, 128>}]} {
    %c0 = arith.constant 0 : index
    %c0_0 = arith.constant 0 : index
    %0 = vector.load %arg1[%c0, %c0_0] : memref<3x256xf32, #tpu.memory_space<vmem>>, vector<3x256xf32>
    %c0_1 = arith.constant 0 : index
    %c0_2 = arith.constant 0 : index
    %1 = vector.load %arg4[%c0_1, %c0_2] : memref<32x3xf32, #tpu.memory_space<vmem>>, vector<32x3xf32>
    %cst = arith.constant dense<0.000000e+00> : vector<32x256xf32>
    %2 = tpu.matmul %1, %0, %cst {dimension_numbers = #tpu.dot_dimension_numbers<[1], [0], [0], [1], [0, 0, 1, 1], [], []>} : vector<32x3xf32>, vector<3x256xf32>, vector<32x256xf32> -> vector<32x256xf32>
    %c0_3 = arith.constant 0 : index
    %c0_4 = arith.constant 0 : index
    %3 = vector.load %arg5[%c0_3, %c0_4] : memref<32x1xf32, #tpu.memory_space<vmem>>, vector<32x1xf32>
    %4 = vector.broadcast %3 : vector<32x1xf32> to vector<32x256xf32>
    %5 = arith.addf %2, %4 : vector<32x256xf32>
    %cst_5 = arith.constant 0.000000e+00 : f32
    %6 = vector.broadcast %cst_5 : f32 to vector<32x256xf32>
    %7 = arith.maximumf %5, %6 : vector<32x256xf32>
    %c0_6 = arith.constant 0 : index
    %c0_7 = arith.constant 0 : index
    %8 = vector.load %arg6[%c0_6, %c0_7] : memref<3x32xf32, #tpu.memory_space<vmem>>, vector<3x32xf32>
    %cst_8 = arith.constant dense<0.000000e+00> : vector<3x256xf32>
    %9 = tpu.matmul %8, %7, %cst_8 {dimension_numbers = #tpu.dot_dimension_numbers<[1], [0], [0], [1], [0, 0, 1, 1], [], []>} : vector<3x32xf32>, vector<32x256xf32>, vector<3x256xf32> -> vector<3x256xf32>
    %c0_9 = arith.constant 0 : index
    %c0_10 = arith.constant 0 : index
    %10 = vector.load %arg7[%c0_9, %c0_10] : memref<3x1xf32, #tpu.memory_space<vmem>>, vector<3x1xf32>
    %11 = vector.broadcast %10 : vector<3x1xf32> to vector<3x256xf32>
    %12 = arith.addf %9, %11 : vector<3x256xf32>
    %13 = arith.addf %0, %12 : vector<3x256xf32>
    %c0_11 = arith.constant 0 : index
    %c0_12 = arith.constant 0 : index
    %14 = vector.load %arg12[%c0_11, %c0_12] : memref<3x256xf32, #tpu.memory_space<vmem>>, vector<3x256xf32>
    tpu.vector_store %arg12[%c0_11, %c0_12], %13 {strides = array<i32>} : memref<3x256xf32, #tpu.memory_space<vmem>>, vector<3x256xf32>,
    %c0_13 = arith.constant 0 : index
    %c0_14 = arith.constant 0 : index
    %15 = vector.load %arg2[%c0_13, %c0_14] : memref<4x256xf32, #tpu.memory_space<vmem>>, vector<4x256xf32>
    %c0_15 = arith.constant 0 : index
    %c0_16 = arith.constant 0 : index
    %16 = vector.load %arg8[%c0_15, %c0_16] : memref<4x32xf32, #tpu.memory_space<vmem>>, vector<4x32xf32>
    %cst_17 = arith.constant dense<0.000000e+00> : vector<4x256xf32>
    %17 = tpu.matmul %16, %7, %cst_17 {dimension_numbers = #tpu.dot_dimension_numbers<[1], [0], [0], [1], [0, 0, 1, 1], [], []>} : vector<4x32xf32>, vector<32x256xf32>, vector<4x256xf32> -> vector<4x256xf32>
    %c0_18 = arith.constant 0 : index
    %c0_19 = arith.constant 0 : index
    %18 = vector.load %arg9[%c0_18, %c0_19] : memref<4x1xf32, #tpu.memory_space<vmem>>, vector<4x1xf32>
    %19 = vector.broadcast %18 : vector<4x1xf32> to vector<4x256xf32>
    %20 = arith.addf %17, %19 : vector<4x256xf32>
    %21 = arith.addf %15, %20 : vector<4x256xf32>
    %c0_20 = arith.constant 0 : index
    %c0_21 = arith.constant 0 : index
    %22 = vector.load %arg13[%c0_20, %c0_21] : memref<4x256xf32, #tpu.memory_space<vmem>>, vector<4x256xf32>
    tpu.vector_store %arg13[%c0_20, %c0_21], %21 {strides = array<i32>} : memref<4x256xf32, #tpu.memory_space<vmem>>, vector<4x256xf32>,
    %c0_22 = arith.constant 0 : index
    %c0_23 = arith.constant 0 : index
    %23 = vector.load %arg3[%c0_22, %c0_23] : memref<3x256xf32, #tpu.memory_space<vmem>>, vector<3x256xf32>
    %c0_24 = arith.constant 0 : index
    %c0_25 = arith.constant 0 : index
    %24 = vector.load %arg10[%c0_24, %c0_25] : memref<3x32xf32, #tpu.memory_space<vmem>>, vector<3x32xf32>
    %cst_26 = arith.constant dense<0.000000e+00> : vector<3x256xf32>
    %25 = tpu.matmul %24, %7, %cst_26 {dimension_numbers = #tpu.dot_dimension_numbers<[1], [0], [0], [1], [0, 0, 1, 1], [], []>} : vector<3x32xf32>, vector<32x256xf32>, vector<3x256xf32> -> vector<3x256xf32>
    %c0_27 = arith.constant 0 : index
    %c0_28 = arith.constant 0 : index
    %26 = vector.load %arg11[%c0_27, %c0_28] : memref<3x1xf32, #tpu.memory_space<vmem>>, vector<3x1xf32>
    %27 = vector.broadcast %26 : vector<3x1xf32> to vector<3x256xf32>
    %28 = arith.addf %25, %27 : vector<3x256xf32>
    %29 = arith.addf %23, %28 : vector<3x256xf32>
    %c0_29 = arith.constant 0 : index
    %c0_30 = arith.constant 0 : index
    %30 = vector.load %arg14[%c0_29, %c0_30] : memref<3x256xf32, #tpu.memory_space<vmem>>, vector<3x256xf32>
    tpu.vector_store %arg14[%c0_29, %c0_30], %29 {strides = array<i32>} : memref<3x256xf32, #tpu.memory_space<vmem>>, vector<3x256xf32>,
    %c256_i32 = arith.constant 256 : i32
    %31 = arith.muli %arg0, %c256_i32 : i32
    %32 = tpu.iota {dimensions = array<i32: 1>} : vector<1x256xi32>
    %33 = vector.broadcast %31 : i32 to vector<1x256xi32>
    %34 = arith.addi %33, %32 : vector<1x256xi32>
    %c256_i32_31 = arith.constant 256 : i32
    %35 = vector.broadcast %c256_i32_31 : i32 to vector<1x256xi32>
    %36 = arith.cmpi slt, %34, %35 : vector<1x256xi32>
    %37 = arith.mulf %12, %12 : vector<3x256xf32>
    %cst_32 = arith.constant 0.000000e+00 : f32
    %38 = vector.shape_cast %36 : vector<1x256xi1> to vector<1x256xi1>
    %39 = vector.broadcast %38 : vector<1x256xi1> to vector<3x256xi1>
    %40 = vector.broadcast %cst_32 : f32 to vector<3x256xf32>
    %41 = arith.select %39, %37, %40 : vector<3x256xi1>, vector<3x256xf32>
    %42 = vector.shape_cast %41 : vector<3x256xf32> to vector<1x3x256xf32>
    %cst_33 = arith.constant dense<0.000000e+00> : vector<1xf32>
    %43 = vector.multi_reduction <add>, %42, %cst_33 [1, 2] : vector<1x3x256xf32> to vector<1xf32>
    %44 = vector.shape_cast %43 : vector<1xf32> to vector<1x1x1xf32>
    %45 = vector.extract %44[0, 0, 0] : f32 from vector<1x1x1xf32>
    %46 = tpu.iota {dimensions = array<i32: 1>} : vector<1x128xi32>
    %c0_i32 = arith.constant 0 : i32
    %47 = vector.broadcast %c0_i32 : i32 to vector<1x128xi32>
    %48 = arith.cmpi eq, %46, %47 : vector<1x128xi32>
    %cst_34 = arith.constant 0.000000e+00 : f32
    %49 = vector.broadcast %45 : f32 to vector<1x128xf32>
    %50 = vector.broadcast %cst_34 : f32 to vector<1x128xf32>
    %51 = arith.select %48, %49, %50 : vector<1x128xi1>, vector<1x128xf32>
    %c0_35 = arith.constant 0 : index
    %c0_36 = arith.constant 0 : index
    %52 = vector.load %arg15[%c0_35, %c0_36] : memref<1x128xf32, #tpu.memory_space<vmem>>, vector<1x128xf32>
    tpu.vector_store %arg15[%c0_35, %c0_36], %51 {strides = array<i32>} : memref<1x128xf32, #tpu.memory_space<vmem>>, vector<1x128xf32>,
    return
  }
  func.func @transform_0(%arg0: i32) -> (i32, i32) {
    %c0_i32 = arith.constant 0 : i32
    %c0_i32_0 = arith.constant 0 : i32
    return %c0_i32, %arg0 : i32, i32
  }
  func.func @transform_1(%arg0: i32) -> (i32, i32) {
    %c0_i32 = arith.constant 0 : i32
    %c0_i32_0 = arith.constant 0 : i32
    return %c0_i32, %arg0 : i32, i32
  }
  func.func @transform_2(%arg0: i32) -> (i32, i32) {
    %c0_i32 = arith.constant 0 : i32
    %c0_i32_0 = arith.constant 0 : i32
    return %c0_i32, %arg0 : i32, i32
  }
  func.func @transform_3(%arg0: i32) -> (i32, i32) {
    %c0_i32 = arith.constant 0 : i32
    %c0_i32_0 = arith.constant 0 : i32
    %c0_i32_1 = arith.constant 0 : i32
    return %c0_i32, %c0_i32_0 : i32, i32
  }
  func.func @transform_4(%arg0: i32) -> (i32, i32) {
    %c0_i32 = arith.constant 0 : i32
    %c0_i32_0 = arith.constant 0 : i32
    %c0_i32_1 = arith.constant 0 : i32
    return %c0_i32, %c0_i32_0 : i32, i32
  }
  func.func @transform_5(%arg0: i32) -> (i32, i32) {
    %c0_i32 = arith.constant 0 : i32
    %c0_i32_0 = arith.constant 0 : i32
    %c0_i32_1 = arith.constant 0 : i32
    return %c0_i32, %c0_i32_0 : i32, i32
  }
  func.func @transform_6(%arg0: i32) -> (i32, i32) {
    %c0_i32 = arith.constant 0 : i32
    %c0_i32_0 = arith.constant 0 : i32
    %c0_i32_1 = arith.constant 0 : i32
    return %c0_i32, %c0_i32_0 : i32, i32
  }
  func.func @transform_7(%arg0: i32) -> (i32, i32) {
    %c0_i32 = arith.constant 0 : i32
    %c0_i32_0 = arith.constant 0 : i32
    %c0_i32_1 = arith.constant 0 : i32
    return %c0_i32, %c0_i32_0 : i32, i32
  }
  func.func @transform_8(%arg0: i32) -> (i32, i32) {
    %c0_i32 = arith.constant 0 : i32
    %c0_i32_0 = arith.constant 0 : i32
    %c0_i32_1 = arith.constant 0 : i32
    return %c0_i32, %c0_i32_0 : i32, i32
  }
  func.func @transform_9(%arg0: i32) -> (i32, i32) {
    %c0_i32 = arith.constant 0 : i32
    %c0_i32_0 = arith.constant 0 : i32
    %c0_i32_1 = arith.constant 0 : i32
    return %c0_i32, %c0_i32_0 : i32, i32
  }
  func.func @transform_10(%arg0: i32) -> (i32, i32) {
    %c0_i32 = arith.constant 0 : i32
    %c0_i32_0 = arith.constant 0 : i32
    %c0_i32_1 = arith.constant 0 : i32
    return %c0_i32, %c0_i32_0 : i32, i32
  }
  func.func @transform_11(%arg0: i32) -> (i32, i32) {
    %c0_i32 = arith.constant 0 : i32
    %c0_i32_0 = arith.constant 0 : i32
    return %c0_i32, %arg0 : i32, i32
  }
  func.func @transform_12(%arg0: i32) -> (i32, i32) {
    %c0_i32 = arith.constant 0 : i32
    %c0_i32_0 = arith.constant 0 : i32
    return %c0_i32, %arg0 : i32, i32
  }
  func.func @transform_13(%arg0: i32) -> (i32, i32) {
    %c0_i32 = arith.constant 0 : i32
    %c0_i32_0 = arith.constant 0 : i32
    return %c0_i32, %arg0 : i32, i32
  }
  func.func @transform_14(%arg0: i32) -> (i32, i32) {
    %c0_i32 = arith.constant 0 : i32
    %c0_i32_0 = arith.constant 0 : i32
    return %c0_i32, %arg0 : i32, i32
  }
}

</mosaic_0001>

<bundles_post_ra>
// kernel: tpu_custom_call.1
= control target key start
LH: loop header
LB: loop body
LE: loop exit
PB: predicated region body
PF: predicated region fallthrough
CT: control target
= control target key end

     0   :  { %20 = vsyncpa [#allocation3], 0  ;;  %s882_s0 = inlined_call_operand.vmem [shape: f32[3,256], index: 0, kind: input, shape index: {}]   ;;  %s883_s1 = inlined_call_operand.vmem [shape: f32[4,256], index: 1, kind: input, shape index: {}]   ;;  %s884_s2 = inlined_call_operand.vmem [shape: f32[3,256], index: 2, kind: input, shape index: {}]   ;;  %s885_s3 = inlined_call_operand.vmem [shape: f32[32,3], index: 3, kind: input, shape index: {}]   ;;  %s886_s4 = inlined_call_operand.vmem [shape: f32[32,1], index: 4, kind: input, shape index: {}]   ;;  %s887_s5 = inlined_call_operand.vmem [shape: f32[3,32], index: 5, kind: input, shape index: {}]   ;;  %s888_s6 = inlined_call_operand.vmem [shape: f32[3,1], index: 6, kind: input, shape index: {}]   ;;  %s889_s7 = inlined_call_operand.vmem [shape: f32[4,32], index: 7, kind: input, shape index: {}]   ;;  %s890_s8 = inlined_call_operand.vmem [shape: f32[4,1], index: 8, kind: input, shape index: {}]   ;;  %s891_s9 = inlined_call_operand.vmem [shape: f32[3,32], index: 9, kind: input, shape index: {}]   ;;  %s892_s10 = inlined_call_operand.vmem [shape: f32[3,1], index: 10, kind: input, shape index: {}]   ;;  %s893_s11 = inlined_call_operand.hbm [shape: f32[3,256], index: 11, kind: output, shape index: {0}]   ;;  %s894_s12 = inlined_call_operand.hbm [shape: f32[4,256], index: 12, kind: output, shape index: {1}]   ;;  %s895_s13 = inlined_call_operand.hbm [shape: f32[3,256], index: 13, kind: output, shape index: {2}]   ;;  %s896_s14 = inlined_call_operand.hbm [shape: f32[1,128], index: 14, kind: output, shape index: {3}]  }
   0x1   :  { %21 = vsyncpa [#allocation5], 0  ;;  %v765_v0 = vld [vmem:[%s882_s0] sm:$0x77]  ;;  %vm89_vm0 = vcmask 1042432   ;;  %v681_v2 = vmov 0.0  }
   0x2   :  { %v75_v1 = vcombine.high %v765_v0, %v765_v0  ;;  %158 = vmatprep.mubr.f32.mxu0 %v681_v2  ;;  %266 = vmatprep.mubr.f32.mxu1 %v681_v2  ;;  %v46_v3 = vld [vmem:[%s885_s3] sm:$0xff]  ;;  %vm76_vm1 = vcmask 23552   ;;  %v682_v4 = vmov 0   ;;  %v52_v6 = vld [vmem:[%s886_s4 + $0x10] sm:$0xff]  ;;  %v51_v7 = vld [vmem:[%s886_s4 + $0x8] sm:$0xff] }
   0x3   :  { %584 = vset.pattern.permute.xlu0 %v682_v4  ;;  %v50_v5 = vld [vmem:[%s886_s4] sm:$0xff]  ;;  %585 = vset.pattern.permute.xlu1 %v682_v4 }
   0x4   :  { %543 = vmatprep.subr.msk.mxu0 %vm89_vm0, %v75_v1  ;;  %56 = vperm.xlu0 %584, %v50_v5  }
   0x5   :  { %544 = vmatpush1.msk.msra.mxu0 %vm89_vm0, %v765_v0  ;;  %66 = vperm.xlu1 %585, %v52_v6  }
   0x6   :  { %22 = vsyncpa [#allocation8], 0  ;;  %545 = vmatmul.mubr.msk.f32.vlgmr.msra.gmra.mrb[0].mxu0 %vm76_vm1, %v46_v3  ;;  %v53_v8 = vld [vmem:[%s886_s4 + $0x18] sm:$0xff]  ;;  %v47_v9 = vld [vmem:[%s885_s3 + $0x8] sm:$0xff]  ;;  %vm198_vm2 = vcmask 261120   ;;  %s683_s20 = smov [#allocation4]  }
   0x7   :  { %164 = vmatprep.mubr.f32.mxu0 %v681_v2  ;;  %v192_v10 = vld [vmem:[%s888_s6] sm:$0x7]  ;;  %v48_v11 = vld [vmem:[%s885_s3 + $0x10] sm:$0xff]  ;;  %v49_v13 = vld [vmem:[%s885_s3 + $0x18] sm:$0xff]  ;;  %s504_s21 = sshll.u32 %s683_s20, 4  ;;  %s684_s22 = smov [#allocation2]   ;;  %s505_s21 = int_to_ptr.vmem [resolvable:$true] %s504_s21 }
   0x8   :  { %61 = vperm.xlu0 %584, %v51_v7   ;;  %v281_v12 = vld [vmem:[%s890_s8] sm:$0xf]  ;;  %s494_s23 = sshll.u32 %s684_s22, 4  ;;  %s587_s24 = scalar_lea.vmem %s505_s21, 128  ;;  %s495_s23 = int_to_ptr.vmem [resolvable:$true] %s494_s23 }
   0x9   :  { %71 = vperm.xlu1 %585, %v53_v8   ;;  %v369_v14 = vld [vmem:[%s892_s10] sm:$0x7]  ;;  %p588_p0 = scmp.ne.s32.totalorder %s505_s21, %s587_s24  ;;  %p592_p1 = scmp.lt.s32.totalorder %s505_s21, %s505_s21 }
   0xa   :  { %546 = vmatmul.mubr.msk.f32.gmra.mrb[2].mxu0 %vm76_vm1, %v47_v9  ;;  %v191_v47 = vld [vmem:[%s887_s5] sm:$0x7]  ;;  %p593_p2 = scmp.lt.s32.totalorder %s587_s24, %s587_s24 }
   0xb   :  { %170 = vmatprep.mubr.f32.mxu0 %v681_v2  ;;  %v368_v48 = vld [vmem:[%s891_s9] sm:$0x7] }
   0xc   :  { %195 = vperm.xlu0 %584, %v192_v10   ;;  %v280_v49 = vld [vmem:[%s889_s7] sm:$0xf]  ;;  %p594_p3 = por %p593_p2, %p592_p1 }
   0xd   :  { %v367_v62 = vld [vmem:[%s884_s2] sm:$0x77] }
   0xe   :  { %547 = vmatmul.mubr.msk.f32.gmra.mrb[4].mxu0 %vm76_vm1, %v48_v11  ;;  %p595_p4 = pnand %p594_p3, %p588_p0 }
   0xf   :  { %176 = vmatprep.mubr.f32.mxu0 %v681_v2 }
  0x10   :  { %284 = vperm.xlu0 %584, %v281_v12   ;;  %v279_v12 = vld [vmem:[%s883_s1] sm:$0xff] }
  0x12   :  { %548 = vmatmul.mubr.msk.f32.gmra.mrb[6].mxu0 %vm76_vm1, %v49_v13 }
  0x13   :  { %442 = vmatprep.mubr.f32.mxu0 %v681_v2 }
  0x14   :  { %372 = vperm.xlu0 %584, %v369_v14  }
  0x83   :  { %v57_v15 = vpop.permute.xlu0 %56 }
  0x84   :  { %v67_v24 = vpop.permute.xlu1 %66 }
  0x87   :  { %v62_v19 = vpop.permute.xlu0 %61 }
  0x88   :  { %v72_v35 = vpop.permute.xlu1 %71 }
  0x8b   :  { %v196_v50 = vpop.permute.xlu0 %195 }
  0x8f   :  { %v285_v51 = vpop.permute.xlu0 %284 }
  0x93   :  { %v373_v52 = vpop.permute.xlu0 %372 }
  0xd9   :  { %v160_v16 = vpop.f32.mrb[0].mxu0 }
  0xda   :  { %v162_v17 = vpop.f32.mrb[1].mxu0  ;;  %v161_v18 = vadd.f32 %v160_v16, %v57_v15 }
  0xdb   :  { %v163_v20 = vadd.f32 %v162_v17, %v57_v15 }
  0xdc   :  { %v183_v26 = vmax.f32 %v161_v18, 0.0 }
  0xdd   :  { %v166_v21 = vpop.f32.mrb[2].mxu0  ;;  %v184_v28 = vmax.f32 %v163_v20, 0.0 }
  0xde   :  { %v167_v22 = vadd.f32 %v166_v21, %v62_v19  ;;  %v168_v23 = vpop.f32.mrb[3].mxu0 }
  0xdf   :  { %v169_v25 = vadd.f32 %v168_v23, %v62_v19 }
  0xe0   :  { %v185_v27 = vmax.f32 %v167_v22, 0.0 }
  0xe1   :  { %v186_v29 = vmax.f32 %v169_v25, 0.0  ;;  %v172_v30 = vpop.f32.mrb[4].mxu0 }
  0xe2   :  { %v554_v31 = vpack.c.bf16 %v185_v27, %v183_v26  ;;  %v174_v32 = vpop.f32.mrb[5].mxu0  ;;  %v173_v34 = vadd.f32 %v172_v30, %v67_v24 }
  0xe3   :  { %v552_v33 = vpack.c.bf16 %v186_v29, %v184_v28  ;;  %v175_v36 = vadd.f32 %v174_v32, %v67_v24 }
  0xe4   :  { %v187_v41 = vmax.f32 %v173_v34, 0.0 }
  0xe5   :  { %v178_v37 = vpop.f32.mrb[6].mxu0  ;;  %553 = vmatprep.subr.bf16.mxu1 %v552_v33  ;;  %569 = vmatprep.subr.bf16.mxu0 %v552_v33  ;;  %v188_v43 = vmax.f32 %v175_v36, 0.0 }
  0xe6   :  { %v179_v38 = vadd.f32 %v178_v37, %v72_v35  ;;  %v180_v39 = vpop.f32.mrb[7].mxu0  ;;  %555 = vmatpush1.bf16.msra.mxu1 %v554_v31  ;;  %571 = vmatpush1.bf16.msra.mxu0 %v554_v31 }
  0xe7   :  { %v181_v40 = vadd.f32 %v180_v39, %v72_v35 }
  0xe8   :  { %v189_v42 = vmax.f32 %v179_v38, 0.0 }
  0xe9   :  { %v190_v44 = vmax.f32 %v181_v40, 0.0 }
  0xea   :  { %v558_v45 = vpack.c.bf16 %v189_v42, %v187_v41 }
  0xeb   :  { %v556_v46 = vpack.c.bf16 %v190_v44, %v188_v43 }
  0xed   :  { %557 = vmatprep.subr.bf16.mxu1 %v556_v46  ;;  %573 = vmatprep.subr.bf16.mxu0 %v556_v46 }
  0xee   :  { %559 = vmatpush1.bf16.msra.mxu1 %v558_v45  ;;  %575 = vmatpush1.bf16.msra.mxu0 %v558_v45 }
  0xef   :  { %561 = vmatprep.subr.bf16.mxu1 %v552_v33 }
  0xf1   :  { %549 = vmatmul.mubr.msk.f32.vlgmr.msra.gmra.mrb[0].mxu1 %vm198_vm2, %v191_v47  ;;  %551 = vmatmul.mubr.msk.f32.vlgmr.msra.gmra.mrb[8].mxu0 %vm198_vm2, %v368_v48 }
  0xf2   :  { %563 = vmatpush1.bf16.msra.mxu1 %v554_v31  ;;  %354 = vmatprep.mubr.f32.mxu1 %v681_v2 }
  0xf3   :  { %565 = vmatprep.subr.bf16.mxu1 %v556_v46 }
  0xf6   :  { %567 = vmatpush1.bf16.msra.mxu1 %v558_v45 }
  0xf9   :  { %550 = vmatmul.mubr.msk.f32.vlgmr.msra.gmra.mrb[2].mxu1 %vm198_vm2, %v280_v49 }
 0x1c4   :  { %v268_v53 = vpop.f32.mrb[0].mxu1  ;;  %v444_v54 = vpop.f32.mrb[8].mxu0 }
 0x1c5   :  { %v269_v55 = vadd.f32 %v268_v53, %v196_v50  ;;  %v445_v56 = vadd.f32 %v444_v54, %v373_v52  ;;  %v270_v57 = vpop.f32.mrb[1].mxu1  ;;  %v446_v58 = vpop.f32.mrb[9].mxu0 }
 0x1c6   :  { %v271_v59 = vadd.f32 %v270_v57, %v196_v50  ;;  %v447_v60 = vadd.f32 %v446_v58, %v373_v52 }
 0x1c7   :  { %v464_v61 = vmul.f32 %v269_v55, %v269_v55 }
 0x1c8   :  { %v275_v63 = vcombine.low %v269_v55, %v271_v59  ;;  %v465_v1 = vmul.f32 %v271_v59, %v271_v59  ;;  %v451_v2 = vcombine.low %v445_v56, %v447_v60 }
 0x1c9   :  { %v472_v3 = vsel %vm89_vm0, %v464_v61, 0.0 }
 0x1ca   :  { %v473_v4 = vsel %vm89_vm0, %v465_v1, 0.0  ;;  %v277_v5 = vadd.f32 %v275_v63, %v765_v0  ;;  %v453_v6 = vadd.f32 %v451_v2, %v367_v62 }
 0x1cb   :  { %v474_v7 = vadd.f32 %v473_v4, %v472_v3 }
 0x1cc   :  { %v356_v8 = vpop.f32.mrb[2].mxu1  ;;  %278 = vst [vmem:[#allocation2] sm:$0x77] %v277_v5  ;;  %454 = vst [vmem:[#allocation6] sm:$0x77] %v453_v6 }
 0x1cd   :  { %v357_v9 = vadd.f32 %v356_v8, %v285_v51  ;;  %v358_v10 = vpop.f32.mrb[3].mxu1  ;;  %475 = vadd.xlane.f32.xlu1 %v474_v7 }
 0x1ce   :  { %v359_v11 = vadd.f32 %v358_v10, %v285_v51 }
 0x1d0   :  { %v363_v13 = vcombine.low %v357_v9, %v359_v11 }
 0x1d2   :  { %v365_v14 = vadd.f32 %v363_v13, %v279_v12 }
 0x1d4   :  { %366 = vst [vmem:[#allocation4] sm:$0xff] %v365_v14 }
 0x1d5   :  { %598 = shalt.err (!%p595_p4)
}
 0x1d6   :  { %s599_s27 = scalar_lea.hbm %s894_s12, 128 }
 0x1d7   :  { %p600_p5 = scmp.ne.s32.totalorder %s894_s12, %s599_s27  ;;  %p603_p6 = scmp.lt.u32.totalorder %s599_s27, %s894_s12 }
 0x1d9   :  { %p605_p7 = pnand %p603_p6, %p600_p5 }
 0x1db   :  { %608 = shalt.err (!%p605_p7)
}
 0x1dc   :  { %507 = dma.vmem_to_hbm [thread:$0]  %s505_s21, 128, %s894_s12, [#allocation5]  }
 0x1dd   :  { %s609_s6 = scalar_lea.vmem %s495_s23, 128  ;;  %p614_p9 = scmp.lt.s32.totalorder %s495_s23, %s495_s23 }
 0x1de   :  { %p610_p8 = scmp.ne.s32.totalorder %s495_s23, %s609_s6  ;;  %p615_p10 = scmp.lt.s32.totalorder %s609_s6, %s609_s6 }
 0x1e0   :  { %p616_p11 = por %p615_p10, %p614_p9 }
 0x1e2   :  { %p617_p12 = pnand %p616_p11, %p610_p8 }
 0x1e4   :  { %620 = shalt.err (!%p617_p12)
}
 0x1e5   :  { %s621_s3 = scalar_lea.hbm %s893_s11, 128 }
 0x1e6   :  { %p622_p13 = scmp.ne.s32.totalorder %s893_s11, %s621_s3  ;;  %p625_p0 = scmp.lt.u32.totalorder %s621_s3, %s893_s11 }
 0x1e8   :  { %p627_p1 = pnand %p625_p0, %p622_p13 }
 0x1ea   :  { %630 = shalt.err (!%p627_p1)
}
 0x1eb   :  { %497 = dma.vmem_to_hbm [thread:$0]  %s495_s23, 128, %s893_s11, [#allocation3]  }
 0x1ec   :  { %s685_s5 = smov [#allocation6]  }
 0x1ed   :  { %s514_s9 = sshll.u32 %s685_s5, 4  ;;  %s515_s9 = int_to_ptr.vmem [resolvable:$true] %s514_s9 }
 0x1ee   :  { %s631_s7 = scalar_lea.vmem %s515_s9, 128  ;;  %p636_p3 = scmp.lt.s32.totalorder %s515_s9, %s515_s9 }
 0x1ef   :  { %p632_p2 = scmp.ne.s32.totalorder %s515_s9, %s631_s7  ;;  %p637_p4 = scmp.lt.s32.totalorder %s631_s7, %s631_s7 }
 0x1f1   :  { %p638_p5 = por %p637_p4, %p636_p3 }
 0x1f3   :  { %p639_p6 = pnand %p638_p5, %p632_p2 }
 0x1f5   :  { %642 = shalt.err (!%p639_p6)
}
 0x1f6   :  { %s643_s21 = scalar_lea.hbm %s895_s13, 128 }
 0x1f7   :  { %p644_p7 = scmp.ne.s32.totalorder %s895_s13, %s643_s21  ;;  %p647_p8 = scmp.lt.u32.totalorder %s643_s21, %s895_s13 }
 0x1f9   :  { %p649_p9 = pnand %p647_p8, %p644_p7 }
 0x1fb   :  { %652 = shalt.err (!%p649_p9)
}
 0x1fc   :  { %517 = dma.vmem_to_hbm [thread:$0]  %s515_s9, 128, %s895_s13, [#allocation5]   ;;  %v456_v21 = vlaneseq }
 0x1fd   :  { %s686_s27 = smov [#allocation7]  }
 0x1fe   :  { %v457_v22 = vand.u32 127, %v456_v21  ;;  %s524_s1 = sshll.u32 %s686_s27, 4  ;;  %s525_s1 = int_to_ptr.vmem [resolvable:$true] %s524_s1 }
 0x1ff   :  { %s653_s29 = scalar_lea.vmem %s525_s1, 16  ;;  %s657_s13 = scalar_lea.vmem %s525_s1, 32 }
 0x200   :  { %vm484_vm3 = vcmp.eq.s32.totalorder %v457_v22, 0  ;;  %p654_p10 = scmp.ne.s32.totalorder %s525_s1, %s653_s29  ;;  %p658_p11 = scmp.lt.s32.totalorder %s525_s1, %s525_s1 }
 0x201   :  { %p659_p12 = scmp.lt.s32.totalorder %s657_s13, %s653_s29 }
 0x203   :  { %p660_p13 = por %p659_p12, %p658_p11 }
 0x205   :  { %p661_p0 = pnand %p660_p13, %p654_p10 }
 0x25a   :  { %v476_v0 = vpop.xlane.xlu1 %475 }
 0x25b   :  { %v477_v15 = vrot.slane %v476_v0, 4 }
 0x25d   :  { %v478_v16 = vadd.f32 %v477_v15, %v476_v0 }
 0x25f   :  { %v479_v17 = vrot.slane %v478_v16, 2 }
 0x261   :  { %v480_v18 = vadd.f32 %v479_v17, %v478_v16 }
 0x263   :  { %v481_v19 = vrot.slane %v480_v18, 1 }
 0x265   :  { %v482_v20 = vadd.f32 %v481_v19, %v480_v18 }
 0x267   :  { %576 = vpush %v482_v20 }
 0x298   :  { %s577_s28 = spop %576 }
 0x299   :  { %v485_v23 = vstv %s577_s28 }
 0x29a   :  { %v486_v24 = vsel %vm484_vm3, %v485_v23, 0.0 }
 0x29b   :  { %487 = vst [vmem:[#allocation7] sm:$0x1] %v486_v24 }
 0x29c   :  { %664 = shalt.err (!%p661_p0)
}
 0x29d   :  { %s665_s15 = scalar_lea.hbm %s896_s14, 16 }
 0x29e   :  { %p666_p1 = scmp.ne.s32.totalorder %s896_s14, %s665_s15  ;;  %p669_p2 = scmp.lt.u32.totalorder %s665_s15, %s896_s14 }
 0x2a0   :  { %p671_p3 = pnand %p669_p2, %p666_p1 }
 0x2a2   :  { %674 = shalt.err (!%p671_p3)
}
 0x2a3   :  { %527 = dma.vmem_to_hbm [thread:$0]  %s525_s1, 16, %s896_s14, [#allocation8]  }
 0x2a4   :  { %675 = dma.done.wait [#allocation3], 128  }
 0x2a5   :  { %676 = vsyncadd [#allocation3], 4294967168 }
 0x2a6   :  { %677 = dma.done.wait [#allocation5], 256  }
 0x2a7   :  { %678 = vsyncadd [#allocation5], 4294967040 }
 0x2a8   :  { %679 = dma.done.wait [#allocation8], 16  }
 0x2a9   :  { %680 = vsyncadd [#allocation8], 4294967280 }
 0x2aa   :  { %540 = vsyncpa [#allocation3], 1 }
 0x2ab   :  { %541 = vsyncpa [#allocation5], 1 }
 0x2ac   :  { %542 = vsyncpa [#allocation8], 1 }

</bundles_post_ra>
